<compile_context>
chip_gen: v5e
topology: v5e:2x2
jax: 0.10.0
libtpu: 0.0.40
codegen_flags: <defaults>
</compile_context>

<pallas_src>
import functools

import numpy as np
import jax
import jax.numpy as jnp
from jax import lax
from jax.experimental import pallas as pl
from jax.experimental.pallas import tpu as pltpu


def _round_up(x, m):
    return ((x + m - 1) // m) * m


def _geo_loss_kernel(slab_ref, out_ref, *, anchors, inv_de10, batch,
                     l_total, tile_l):
    """slab block: (20, 8, tile_l) f32.
    Channel rows: a1(0:3) b1(3:6) c1(6:9) t(9:12) t_p(12:15)
                  d(15) d_p(16) A1_d(17) B1_d(18) C1_d(19).
    Batch index b lives at (sublane = b // l_total, lane = b % l_total)."""
    eps2 = 1e-16  # (torch cosine_similarity eps=1e-8)^2 on the product of squared norms
    i = pl.program_id(0)

    @pl.when(i == 0)
    def _init():
        out_ref[...] = jnp.zeros_like(out_ref)

    def ch(c):                                   # one (8, tile_l) channel tile
        return slab_ref[c]

    def vec3(c0):
        return (ch(c0), ch(c0 + 1), ch(c0 + 2))

    a1, b1, c1 = vec3(0), vec3(3), vec3(6)
    t, t_p = vec3(9), vec3(12)
    d, d_p = ch(15), ch(16)
    A1_d, B1_d, C1_d = ch(17), ch(18), ch(19)

    def dot3(x, y):                              # pure VPU: 3 mul + 2 add
        return x[0] * y[0] + x[1] * y[1] + x[2] * y[2]

    T_p = (t_p[0] * d_p, t_p[1] * d_p, t_p[2] * d_p)  # predicted 3D point

    def cos_sim(x, y):
        return dot3(x, y) * lax.rsqrt(jnp.maximum(dot3(x, x) * dot3(y, y), eps2))

    t_c = 1.0 - cos_sim(t, t_p)                  # (8, tile_l)

    def anchor_terms(anchor, dirn, target_dist):
        ax, ay, az = anchor                      # compile-time floats
        cord = (T_p[0] + ax, T_p[1] + ay, T_p[2] + az)
        ss = dot3(cord, cord)                    # |cord|^2
        cos = dot3(cord, dirn) * lax.rsqrt(jnp.maximum(ss * dot3(dirn, dirn), eps2))
        return 1.0 - cos, jnp.abs(jnp.sqrt(ss) - target_dist)

    a_c, a_d = anchor_terms(anchors[0], a1, A1_d)
    b_c, b_d = anchor_terms(anchors[1], b1, B1_d)
    c_c, c_d = anchor_terms(anchors[2], c1, C1_d)

    # fuse before the cross-lane reduce (5 reductions total instead of 11)
    abc_c = a_c + b_c + c_c
    abc_d = a_d + b_d + c_d
    td = jnp.abs(d_p - d)
    sq = lambda x: x * x
    tsq = sq(t[0] * d - T_p[0]) + sq(t[1] * d - T_p[1]) + sq(t[2] * d - T_p[2])

    # mask out batch padding: flat batch index = sublane * l_total + global lane
    sub = lax.broadcasted_iota(jnp.int32, (8, tile_l), 0)
    lane = lax.broadcasted_iota(jnp.int32, (8, tile_l), 1) + i * tile_l
    mask = ((sub * l_total + lane) < batch).astype(jnp.float32)

    def msum(x):                                 # masked full-tile sum -> (1, 1)
        return jnp.sum(x * mask, keepdims=True)

    inv_b = 1.0 / batch                          # constants folded at trace time
    s_tc = msum(t_c) * inv_b
    s_abc = msum(abc_c) * (inv_b / 3.0)
    s_td = msum(td) * (inv_de10 * inv_b)
    s_abd = msum(abc_d) * (inv_de10 * inv_b / 3.0)
    s_tl = msum(tsq) * (inv_de10 * inv_de10 * inv_b / 3.0)

    lane8 = lax.broadcasted_iota(jnp.int32, (1, 8), 1)
    contrib = (jnp.where(lane8 == 0, s_tc, 0.0)
               + jnp.where(lane8 == 1, s_abc, 0.0)
               + jnp.where(lane8 == 2, s_td, 0.0)
               + jnp.where(lane8 == 3, s_abd, 0.0)
               + jnp.where(lane8 == 4, s_tl, 0.0))
    out_ref[...] += contrib


class GeoLossPallas:
    """JAX/Pallas port of GeoLoss.forward (returns 5 scalar losses)."""

    def __init__(self, r, data_expansion):
        de = float(data_expansion)
        rr = float(r) * de
        sqrt3 = float(np.sqrt(3.0))
        self.data_expansion = de
        self.anchors = ((0.0, 0.0, sqrt3 * rr / 3.0),
                        (0.0, -rr / 2.0, -sqrt3 * rr / 6.0),
                        (0.0, rr / 2.0, -sqrt3 * rr / 6.0))
        self._inv_de10 = 10.0 / de

        def fwd(a1, b1, c1, A1_d, B1_d, C1_d, t, d, t_p, d_p):
            f32 = lambda x: jnp.asarray(x, jnp.float32)
            batch = t.shape[0]
            l_needed = -(-batch // 8)                        # ceil(B / 8) lanes
            tile_l = min(512, _round_up(l_needed, 128))      # 128..512 lanes/tile
            l_total = _round_up(l_needed, tile_l)
            n_tiles = l_total // tile_l
            padded = 8 * l_total

            # TODO(synk): have the upstream producer emit this (20, 8, L)
            # batch-on-(sublane,lane) slab directly so this repack (an extra
            # HBM write+read of ~80*B bytes) disappears at large B.
            rows = jnp.concatenate(
                [f32(a1).T, f32(b1).T, f32(c1).T, f32(t).T, f32(t_p).T,
                 f32(d).reshape(1, -1), f32(d_p).reshape(1, -1),
                 f32(A1_d).reshape(1, -1), f32(B1_d).reshape(1, -1),
                 f32(C1_d).reshape(1, -1)], axis=0)          # (20, B)
            rows = jnp.pad(rows, ((0, 0), (0, padded - batch)))
            slab = rows.reshape(20, 8, l_total)              # zero-padded, masked in-kernel

            kernel = functools.partial(
                _geo_loss_kernel, anchors=self.anchors,
                inv_de10=self._inv_de10, batch=batch,
                l_total=l_total, tile_l=tile_l)

            out = pl.pallas_call(
                kernel,
                out_shape=jax.ShapeDtypeStruct((1, 8), jnp.float32),
                grid_spec=pltpu.PrefetchScalarGridSpec(
                    num_scalar_prefetch=0,
                    grid=(n_tiles,),
                    in_specs=[pl.BlockSpec((20, 8, tile_l),
                                           lambda i: (0, 0, i))],
                    out_specs=pl.BlockSpec((1, 8), lambda i: (0, 0))),
                compiler_params=pltpu.CompilerParams(
                    dimension_semantics=("arbitrary",)),      # reduction axis
            )(slab)
            # TODO(synk): on v7x, split tiles across the two TensorCores with a
            # leading "parallel" core axis writing per-core partial rows into a
            # (2, 8) output summed here; the batch axis itself must stay
            # "arbitrary" (it reduces into one shared block).
            return out[0, 0], out[0, 1], out[0, 2], out[0, 3], out[0, 4]

        self._fwd = jax.jit(fwd)

    def __call__(self, a1, b1, c1, A1_d, B1_d, C1_d, t, d, t_p, d_p):
        return self._fwd(a1, b1, c1, A1_d, B1_d, C1_d, t, d, t_p, d_p)


def _reference(loss, a1, b1, c1, A1_d, B1_d, C1_d, t, d, t_p, d_p):
    """Pure-JAX mirror of the PyTorch forward, for a correctness check."""
    de = loss.data_expansion
    abc = jnp.asarray(loss.anchors, jnp.float32)
    eps = 1e-8
    T_p = t_p * d_p

    def c2v(i):
        c = T_p + abc[i][None, :]
        dd = jnp.linalg.norm(c, axis=1, keepdims=True)
        return dd, c / dd

    Adp, a1p = c2v(0)
    Bdp, b1p = c2v(1)
    Cdp, c1p = c2v(2)

    def closs(x, y):
        cos = jnp.sum(x * y, axis=1) / jnp.maximum(
            jnp.linalg.norm(x, axis=1) * jnp.linalg.norm(y, axis=1), eps)
        return jnp.mean(1.0 - cos)

    t_closs = closs(t, t_p)
    abc_closs = (closs(a1p, a1) + closs(b1p, b1) + closs(c1p, c1)) / 3.0
    T_dloss = jnp.mean(jnp.abs(d_p - d)) / de * 10.0
    ABC_dloss = (jnp.mean(jnp.abs(Adp - A1_d.reshape(-1, 1)))
                 + jnp.mean(jnp.abs(Bdp - B1_d.reshape(-1, 1)))
                 + jnp.mean(jnp.abs(Cdp - C1_d.reshape(-1, 1)))) / de * 10.0 / 3.0
    T = t * d / de * 10.0
    Tp = t_p * d_p / de * 10.0
    T_loss = jnp.mean((T - Tp) ** 2)
    return (t_closs, abc_closs, T_dloss, ABC_dloss, T_loss)


if __name__ == "__main__":
    data_expansion = 100.0
    r = 2.0
    loss = GeoLossPallas(r=r, data_expansion=data_expansion)

    def make_inputs(seed, B):
        key = jax.random.PRNGKey(seed)
        ks = jax.random.split(key, 10)

        def unit(k, shape):
            v = jax.random.normal(k, shape, jnp.float32)
            return v / jnp.linalg.norm(v, axis=-1, keepdims=True)

        a1 = unit(ks[0], (B, 3))
        b1 = unit(ks[1], (B, 3))
        c1 = unit(ks[2], (B, 3))
        t = unit(ks[3], (B, 3))
        t_p = unit(ks[4], (B, 3))
        d = (jnp.abs(jax.random.normal(ks[5], (B, 1), jnp.float32)) + 0.5) * data_expansion
        d_p = (jnp.abs(jax.random.normal(ks[6], (B, 1), jnp.float32)) + 0.5) * data_expansion
        A1_d = jnp.abs(jax.random.normal(ks[7], (B,), jnp.float32)) * data_expansion + data_expansion
        B1_d = jnp.abs(jax.random.normal(ks[8], (B,), jnp.float32)) * data_expansion + data_expansion
        C1_d = jnp.abs(jax.random.normal(ks[9], (B,), jnp.float32)) * data_expansion + data_expansion
        return (a1, b1, c1, A1_d, B1_d, C1_d, t, d, t_p, d_p)

    # B=8 (tiny) and B=19 (exercises in-kernel padding mask)
    for seed, B in ((0, 8), (0, 19)):
        args = make_inputs(seed, B)
        outs = jax.block_until_ready(loss(*args))
        refs = _reference(loss, *args)
        for got, want in zip(outs, refs):
            np.testing.assert_allclose(np.asarray(got), np.asarray(want),
                                       rtol=1e-4, atol=1e-4)

    print("KERNEL_OK")
</pallas_src>

<mosaic_0001>
module attributes {stable_mosaic.version = 11 : i64} {
  func.func @_geo_loss_kernel(%arg0: i32, %arg1: memref<20x8x128xf32, #tpu.memory_space<vmem>>, %arg2: memref<1x8xf32, #tpu.memory_space<vmem>>) attributes {dimension_semantics = [#tpu.dimension_semantics<arbitrary>], iteration_bounds = array<i64: 1>, scalar_prefetch = 0 : i64, scratch_operands = 0 : i64, tpu.core_type = #tpu.core_type<tc>, window_params = [{transform_indices = @transform_0, window_bounds = array<i64: 20, 8, 128>}, {pipeline_mode = #tpu.pipeline_mode<synchronous>, transform_indices = @transform_1, window_bounds = array<i64: 1, 8>}]} {
    %c0_i32 = arith.constant 0 : i32
    %0 = arith.cmpi eq, %arg0, %c0_i32 : i32
    %1 = arith.extui %0 : i1 to i32
    %c0_i32_0 = arith.constant 0 : i32
    %2 = arith.cmpi ne, %1, %c0_i32_0 : i32
    scf.if %2 {
      %cst_78 = arith.constant 0.000000e+00 : f32
      %268 = vector.broadcast %cst_78 : f32 to vector<1x8xf32>
      %c0_79 = arith.constant 0 : index
      %c0_80 = arith.constant 0 : index
      %269 = vector.load %arg2[%c0_79, %c0_80] : memref<1x8xf32, #tpu.memory_space<vmem>>, vector<1x8xf32>
      tpu.vector_store %arg2[%c0_79, %c0_80], %268 {strides = array<i32>} : memref<1x8xf32, #tpu.memory_space<vmem>>, vector<1x8xf32>,
    } else {
    }
    %c0 = arith.constant 0 : index
    %c0_1 = arith.constant 0 : index
    %c0_2 = arith.constant 0 : index
    %3 = vector.load %arg1[%c0, %c0_1, %c0_2] : memref<20x8x128xf32, #tpu.memory_space<vmem>>, vector<1x8x128xf32>
    %4 = vector.shape_cast %3 : vector<1x8x128xf32> to vector<8x128xf32>
    %c1 = arith.constant 1 : index
    %c0_3 = arith.constant 0 : index
    %c0_4 = arith.constant 0 : index
    %5 = vector.load %arg1[%c1, %c0_3, %c0_4] : memref<20x8x128xf32, #tpu.memory_space<vmem>>, vector<1x8x128xf32>
    %6 = vector.shape_cast %5 : vector<1x8x128xf32> to vector<8x128xf32>
    %c2 = arith.constant 2 : index
    %c0_5 = arith.constant 0 : index
    %c0_6 = arith.constant 0 : index
    %7 = vector.load %arg1[%c2, %c0_5, %c0_6] : memref<20x8x128xf32, #tpu.memory_space<vmem>>, vector<1x8x128xf32>
    %8 = vector.shape_cast %7 : vector<1x8x128xf32> to vector<8x128xf32>
    %c3 = arith.constant 3 : index
    %c0_7 = arith.constant 0 : index
    %c0_8 = arith.constant 0 : index
    %9 = vector.load %arg1[%c3, %c0_7, %c0_8] : memref<20x8x128xf32, #tpu.memory_space<vmem>>, vector<1x8x128xf32>
    %10 = vector.shape_cast %9 : vector<1x8x128xf32> to vector<8x128xf32>
    %c4 = arith.constant 4 : index
    %c0_9 = arith.constant 0 : index
    %c0_10 = arith.constant 0 : index
    %11 = vector.load %arg1[%c4, %c0_9, %c0_10] : memref<20x8x128xf32, #tpu.memory_space<vmem>>, vector<1x8x128xf32>
    %12 = vector.shape_cast %11 : vector<1x8x128xf32> to vector<8x128xf32>
    %c5 = arith.constant 5 : index
    %c0_11 = arith.constant 0 : index
    %c0_12 = arith.constant 0 : index
    %13 = vector.load %arg1[%c5, %c0_11, %c0_12] : memref<20x8x128xf32, #tpu.memory_space<vmem>>, vector<1x8x128xf32>
    %14 = vector.shape_cast %13 : vector<1x8x128xf32> to vector<8x128xf32>
    %c6 = arith.constant 6 : index
    %c0_13 = arith.constant 0 : index
    %c0_14 = arith.constant 0 : index
    %15 = vector.load %arg1[%c6, %c0_13, %c0_14] : memref<20x8x128xf32, #tpu.memory_space<vmem>>, vector<1x8x128xf32>
    %16 = vector.shape_cast %15 : vector<1x8x128xf32> to vector<8x128xf32>
    %c7 = arith.constant 7 : index
    %c0_15 = arith.constant 0 : index
    %c0_16 = arith.constant 0 : index
    %17 = vector.load %arg1[%c7, %c0_15, %c0_16] : memref<20x8x128xf32, #tpu.memory_space<vmem>>, vector<1x8x128xf32>
    %18 = vector.shape_cast %17 : vector<1x8x128xf32> to vector<8x128xf32>
    %c8 = arith.constant 8 : index
    %c0_17 = arith.constant 0 : index
    %c0_18 = arith.constant 0 : index
    %19 = vector.load %arg1[%c8, %c0_17, %c0_18] : memref<20x8x128xf32, #tpu.memory_space<vmem>>, vector<1x8x128xf32>
    %20 = vector.shape_cast %19 : vector<1x8x128xf32> to vector<8x128xf32>
    %c9 = arith.constant 9 : index
    %c0_19 = arith.constant 0 : index
    %c0_20 = arith.constant 0 : index
    %21 = vector.load %arg1[%c9, %c0_19, %c0_20] : memref<20x8x128xf32, #tpu.memory_space<vmem>>, vector<1x8x128xf32>
    %22 = vector.shape_cast %21 : vector<1x8x128xf32> to vector<8x128xf32>
    %c10 = arith.constant 10 : index
    %c0_21 = arith.constant 0 : index
    %c0_22 = arith.constant 0 : index
    %23 = vector.load %arg1[%c10, %c0_21, %c0_22] : memref<20x8x128xf32, #tpu.memory_space<vmem>>, vector<1x8x128xf32>
    %24 = vector.shape_cast %23 : vector<1x8x128xf32> to vector<8x128xf32>
    %c11 = arith.constant 11 : index
    %c0_23 = arith.constant 0 : index
    %c0_24 = arith.constant 0 : index
    %25 = vector.load %arg1[%c11, %c0_23, %c0_24] : memref<20x8x128xf32, #tpu.memory_space<vmem>>, vector<1x8x128xf32>
    %26 = vector.shape_cast %25 : vector<1x8x128xf32> to vector<8x128xf32>
    %c12 = arith.constant 12 : index
    %c0_25 = arith.constant 0 : index
    %c0_26 = arith.constant 0 : index
    %27 = vector.load %arg1[%c12, %c0_25, %c0_26] : memref<20x8x128xf32, #tpu.memory_space<vmem>>, vector<1x8x128xf32>
    %28 = vector.shape_cast %27 : vector<1x8x128xf32> to vector<8x128xf32>
    %c13 = arith.constant 13 : index
    %c0_27 = arith.constant 0 : index
    %c0_28 = arith.constant 0 : index
    %29 = vector.load %arg1[%c13, %c0_27, %c0_28] : memref<20x8x128xf32, #tpu.memory_space<vmem>>, vector<1x8x128xf32>
    %30 = vector.shape_cast %29 : vector<1x8x128xf32> to vector<8x128xf32>
    %c14 = arith.constant 14 : index
    %c0_29 = arith.constant 0 : index
    %c0_30 = arith.constant 0 : index
    %31 = vector.load %arg1[%c14, %c0_29, %c0_30] : memref<20x8x128xf32, #tpu.memory_space<vmem>>, vector<1x8x128xf32>
    %32 = vector.shape_cast %31 : vector<1x8x128xf32> to vector<8x128xf32>
    %c15 = arith.constant 15 : index
    %c0_31 = arith.constant 0 : index
    %c0_32 = arith.constant 0 : index
    %33 = vector.load %arg1[%c15, %c0_31, %c0_32] : memref<20x8x128xf32, #tpu.memory_space<vmem>>, vector<1x8x128xf32>
    %34 = vector.shape_cast %33 : vector<1x8x128xf32> to vector<8x128xf32>
    %c16 = arith.constant 16 : index
    %c0_33 = arith.constant 0 : index
    %c0_34 = arith.constant 0 : index
    %35 = vector.load %arg1[%c16, %c0_33, %c0_34] : memref<20x8x128xf32, #tpu.memory_space<vmem>>, vector<1x8x128xf32>
    %36 = vector.shape_cast %35 : vector<1x8x128xf32> to vector<8x128xf32>
    %c17 = arith.constant 17 : index
    %c0_35 = arith.constant 0 : index
    %c0_36 = arith.constant 0 : index
    %37 = vector.load %arg1[%c17, %c0_35, %c0_36] : memref<20x8x128xf32, #tpu.memory_space<vmem>>, vector<1x8x128xf32>
    %38 = vector.shape_cast %37 : vector<1x8x128xf32> to vector<8x128xf32>
    %c18 = arith.constant 18 : index
    %c0_37 = arith.constant 0 : index
    %c0_38 = arith.constant 0 : index
    %39 = vector.load %arg1[%c18, %c0_37, %c0_38] : memref<20x8x128xf32, #tpu.memory_space<vmem>>, vector<1x8x128xf32>
    %40 = vector.shape_cast %39 : vector<1x8x128xf32> to vector<8x128xf32>
    %c19 = arith.constant 19 : index
    %c0_39 = arith.constant 0 : index
    %c0_40 = arith.constant 0 : index
    %41 = vector.load %arg1[%c19, %c0_39, %c0_40] : memref<20x8x128xf32, #tpu.memory_space<vmem>>, vector<1x8x128xf32>
    %42 = vector.shape_cast %41 : vector<1x8x128xf32> to vector<8x128xf32>
    %43 = arith.mulf %28, %36 : vector<8x128xf32>
    %44 = arith.mulf %30, %36 : vector<8x128xf32>
    %45 = arith.mulf %32, %36 : vector<8x128xf32>
    %46 = arith.mulf %22, %28 : vector<8x128xf32>
    %47 = arith.mulf %24, %30 : vector<8x128xf32>
    %48 = arith.addf %46, %47 : vector<8x128xf32>
    %49 = arith.mulf %26, %32 : vector<8x128xf32>
    %50 = arith.addf %48, %49 : vector<8x128xf32>
    %51 = arith.mulf %22, %22 : vector<8x128xf32>
    %52 = arith.mulf %24, %24 : vector<8x128xf32>
    %53 = arith.addf %51, %52 : vector<8x128xf32>
    %54 = arith.mulf %26, %26 : vector<8x128xf32>
    %55 = arith.addf %53, %54 : vector<8x128xf32>
    %56 = arith.mulf %28, %28 : vector<8x128xf32>
    %57 = arith.mulf %30, %30 : vector<8x128xf32>
    %58 = arith.addf %56, %57 : vector<8x128xf32>
    %59 = arith.mulf %32, %32 : vector<8x128xf32>
    %60 = arith.addf %58, %59 : vector<8x128xf32>
    %61 = arith.mulf %55, %60 : vector<8x128xf32>
    %cst = arith.constant 1.000000e-16 : f32
    %62 = vector.broadcast %cst : f32 to vector<8x128xf32>
    %63 = arith.maximumf %61, %62 : vector<8x128xf32>
    %64 = math.rsqrt %63 : vector<8x128xf32>
    %65 = arith.mulf %50, %64 : vector<8x128xf32>
    %cst_41 = arith.constant 1.000000e+00 : f32
    %66 = vector.broadcast %cst_41 : f32 to vector<8x128xf32>
    %67 = arith.subf %66, %65 : vector<8x128xf32>
    %cst_42 = arith.constant 0.000000e+00 : f32
    %68 = vector.broadcast %cst_42 : f32 to vector<8x128xf32>
    %69 = arith.addf %43, %68 : vector<8x128xf32>
    %cst_43 = arith.constant 0.000000e+00 : f32
    %70 = vector.broadcast %cst_43 : f32 to vector<8x128xf32>
    %71 = arith.addf %44, %70 : vector<8x128xf32>
    %cst_44 = arith.constant 115.470055 : f32
    %72 = vector.broadcast %cst_44 : f32 to vector<8x128xf32>
    %73 = arith.addf %45, %72 : vector<8x128xf32>
    %74 = arith.mulf %69, %69 : vector<8x128xf32>
    %75 = arith.mulf %71, %71 : vector<8x128xf32>
    %76 = arith.addf %74, %75 : vector<8x128xf32>
    %77 = arith.mulf %73, %73 : vector<8x128xf32>
    %78 = arith.addf %76, %77 : vector<8x128xf32>
    %79 = arith.mulf %69, %4 : vector<8x128xf32>
    %80 = arith.mulf %71, %6 : vector<8x128xf32>
    %81 = arith.addf %79, %80 : vector<8x128xf32>
    %82 = arith.mulf %73, %8 : vector<8x128xf32>
    %83 = arith.addf %81, %82 : vector<8x128xf32>
    %84 = arith.mulf %4, %4 : vector<8x128xf32>
    %85 = arith.mulf %6, %6 : vector<8x128xf32>
    %86 = arith.addf %84, %85 : vector<8x128xf32>
    %87 = arith.mulf %8, %8 : vector<8x128xf32>
    %88 = arith.addf %86, %87 : vector<8x128xf32>
    %89 = arith.mulf %78, %88 : vector<8x128xf32>
    %cst_45 = arith.constant 1.000000e-16 : f32
    %90 = vector.broadcast %cst_45 : f32 to vector<8x128xf32>
    %91 = arith.maximumf %89, %90 : vector<8x128xf32>
    %92 = math.rsqrt %91 : vector<8x128xf32>
    %93 = arith.mulf %83, %92 : vector<8x128xf32>
    %cst_46 = arith.constant 1.000000e+00 : f32
    %94 = vector.broadcast %cst_46 : f32 to vector<8x128xf32>
    %95 = arith.subf %94, %93 : vector<8x128xf32>
    %96 = math.sqrt %78 : vector<8x128xf32>
    %97 = arith.subf %96, %38 : vector<8x128xf32>
    %98 = math.absf %97 : vector<8x128xf32>
    %cst_47 = arith.constant 0.000000e+00 : f32
    %99 = vector.broadcast %cst_47 : f32 to vector<8x128xf32>
    %100 = arith.addf %43, %99 : vector<8x128xf32>
    %cst_48 = arith.constant -1.000000e+02 : f32
    %101 = vector.broadcast %cst_48 : f32 to vector<8x128xf32>
    %102 = arith.addf %44, %101 : vector<8x128xf32>
    %cst_49 = arith.constant -57.7350273 : f32
    %103 = vector.broadcast %cst_49 : f32 to vector<8x128xf32>
    %104 = arith.addf %45, %103 : vector<8x128xf32>
    %105 = arith.mulf %100, %100 : vector<8x128xf32>
    %106 = arith.mulf %102, %102 : vector<8x128xf32>
    %107 = arith.addf %105, %106 : vector<8x128xf32>
    %108 = arith.mulf %104, %104 : vector<8x128xf32>
    %109 = arith.addf %107, %108 : vector<8x128xf32>
    %110 = arith.mulf %100, %10 : vector<8x128xf32>
    %111 = arith.mulf %102, %12 : vector<8x128xf32>
    %112 = arith.addf %110, %111 : vector<8x128xf32>
    %113 = arith.mulf %104, %14 : vector<8x128xf32>
    %114 = arith.addf %112, %113 : vector<8x128xf32>
    %115 = arith.mulf %10, %10 : vector<8x128xf32>
    %116 = arith.mulf %12, %12 : vector<8x128xf32>
    %117 = arith.addf %115, %116 : vector<8x128xf32>
    %118 = arith.mulf %14, %14 : vector<8x128xf32>
    %119 = arith.addf %117, %118 : vector<8x128xf32>
    %120 = arith.mulf %109, %119 : vector<8x128xf32>
    %cst_50 = arith.constant 1.000000e-16 : f32
    %121 = vector.broadcast %cst_50 : f32 to vector<8x128xf32>
    %122 = arith.maximumf %120, %121 : vector<8x128xf32>
    %123 = math.rsqrt %122 : vector<8x128xf32>
    %124 = arith.mulf %114, %123 : vector<8x128xf32>
    %cst_51 = arith.constant 1.000000e+00 : f32
    %125 = vector.broadcast %cst_51 : f32 to vector<8x128xf32>
    %126 = arith.subf %125, %124 : vector<8x128xf32>
    %127 = math.sqrt %109 : vector<8x128xf32>
    %128 = arith.subf %127, %40 : vector<8x128xf32>
    %129 = math.absf %128 : vector<8x128xf32>
    %cst_52 = arith.constant 0.000000e+00 : f32
    %130 = vector.broadcast %cst_52 : f32 to vector<8x128xf32>
    %131 = arith.addf %43, %130 : vector<8x128xf32>
    %cst_53 = arith.constant 1.000000e+02 : f32
    %132 = vector.broadcast %cst_53 : f32 to vector<8x128xf32>
    %133 = arith.addf %44, %132 : vector<8x128xf32>
    %cst_54 = arith.constant -57.7350273 : f32
    %134 = vector.broadcast %cst_54 : f32 to vector<8x128xf32>
    %135 = arith.addf %45, %134 : vector<8x128xf32>
    %136 = arith.mulf %131, %131 : vector<8x128xf32>
    %137 = arith.mulf %133, %133 : vector<8x128xf32>
    %138 = arith.addf %136, %137 : vector<8x128xf32>
    %139 = arith.mulf %135, %135 : vector<8x128xf32>
    %140 = arith.addf %138, %139 : vector<8x128xf32>
    %141 = arith.mulf %131, %16 : vector<8x128xf32>
    %142 = arith.mulf %133, %18 : vector<8x128xf32>
    %143 = arith.addf %141, %142 : vector<8x128xf32>
    %144 = arith.mulf %135, %20 : vector<8x128xf32>
    %145 = arith.addf %143, %144 : vector<8x128xf32>
    %146 = arith.mulf %16, %16 : vector<8x128xf32>
    %147 = arith.mulf %18, %18 : vector<8x128xf32>
    %148 = arith.addf %146, %147 : vector<8x128xf32>
    %149 = arith.mulf %20, %20 : vector<8x128xf32>
    %150 = arith.addf %148, %149 : vector<8x128xf32>
    %151 = arith.mulf %140, %150 : vector<8x128xf32>
    %cst_55 = arith.constant 1.000000e-16 : f32
    %152 = vector.broadcast %cst_55 : f32 to vector<8x128xf32>
    %153 = arith.maximumf %151, %152 : vector<8x128xf32>
    %154 = math.rsqrt %153 : vector<8x128xf32>
    %155 = arith.mulf %145, %154 : vector<8x128xf32>
    %cst_56 = arith.constant 1.000000e+00 : f32
    %156 = vector.broadcast %cst_56 : f32 to vector<8x128xf32>
    %157 = arith.subf %156, %155 : vector<8x128xf32>
    %158 = math.sqrt %140 : vector<8x128xf32>
    %159 = arith.subf %158, %42 : vector<8x128xf32>
    %160 = math.absf %159 : vector<8x128xf32>
    %161 = arith.addf %95, %126 : vector<8x128xf32>
    %162 = arith.addf %161, %157 : vector<8x128xf32>
    %163 = arith.addf %98, %129 : vector<8x128xf32>
    %164 = arith.addf %163, %160 : vector<8x128xf32>
    %165 = arith.subf %36, %34 : vector<8x128xf32>
    %166 = math.absf %165 : vector<8x128xf32>
    %167 = arith.mulf %22, %34 : vector<8x128xf32>
    %168 = arith.subf %167, %43 : vector<8x128xf32>
    %169 = arith.mulf %168, %168 : vector<8x128xf32>
    %170 = arith.mulf %24, %34 : vector<8x128xf32>
    %171 = arith.subf %170, %44 : vector<8x128xf32>
    %172 = arith.mulf %171, %171 : vector<8x128xf32>
    %173 = arith.addf %169, %172 : vector<8x128xf32>
    %174 = arith.mulf %26, %34 : vector<8x128xf32>
    %175 = arith.subf %174, %45 : vector<8x128xf32>
    %176 = arith.mulf %175, %175 : vector<8x128xf32>
    %177 = arith.addf %173, %176 : vector<8x128xf32>
    %178 = tpu.iota {dimensions = array<i32: 0>} : vector<8x128xi32>
    %179 = tpu.iota {dimensions = array<i32: 1>} : vector<8x128xi32>
    %c128_i32 = arith.constant 128 : i32
    %180 = arith.muli %arg0, %c128_i32 : i32
    %181 = vector.broadcast %180 : i32 to vector<8x128xi32>
    %182 = arith.addi %179, %181 : vector<8x128xi32>
    %c128_i32_57 = arith.constant 128 : i32
    %183 = vector.broadcast %c128_i32_57 : i32 to vector<8x128xi32>
    %184 = arith.muli %178, %183 : vector<8x128xi32>
    %185 = arith.addi %184, %182 : vector<8x128xi32>
    %c8_i32 = arith.constant 8 : i32
    %186 = vector.broadcast %c8_i32 : i32 to vector<8x128xi32>
    %187 = arith.cmpi slt, %185, %186 : vector<8x128xi32>
    %188 = arith.extui %187 : vector<8x128xi1> to vector<8x128xi32>
    %189 = arith.sitofp %188 : vector<8x128xi32> to vector<8x128xf32>
    %190 = arith.mulf %67, %189 : vector<8x128xf32>
    %191 = vector.shape_cast %190 : vector<8x128xf32> to vector<1x8x128xf32>
    %cst_58 = arith.constant dense<0.000000e+00> : vector<1xf32>
    %192 = vector.multi_reduction <add>, %191, %cst_58 [1, 2] : vector<1x8x128xf32> to vector<1xf32>
    %193 = vector.shape_cast %192 : vector<1xf32> to vector<1x1x1xf32>
    %194 = vector.extract %193[0, 0, 0] : f32 from vector<1x1x1xf32>
    %195 = vector.broadcast %194 : f32 to vector<1x1xf32>
    %cst_59 = arith.constant 1.250000e-01 : f32
    %196 = vector.broadcast %cst_59 : f32 to vector<1x1xf32>
    %197 = arith.mulf %195, %196 : vector<1x1xf32>
    %198 = arith.mulf %162, %189 : vector<8x128xf32>
    %199 = vector.shape_cast %198 : vector<8x128xf32> to vector<1x8x128xf32>
    %cst_60 = arith.constant dense<0.000000e+00> : vector<1xf32>
    %200 = vector.multi_reduction <add>, %199, %cst_60 [1, 2] : vector<1x8x128xf32> to vector<1xf32>
    %201 = vector.shape_cast %200 : vector<1xf32> to vector<1x1x1xf32>
    %202 = vector.extract %201[0, 0, 0] : f32 from vector<1x1x1xf32>
    %203 = vector.broadcast %202 : f32 to vector<1x1xf32>
    %cst_61 = arith.constant 0.0416666679 : f32
    %204 = vector.broadcast %cst_61 : f32 to vector<1x1xf32>
    %205 = arith.mulf %203, %204 : vector<1x1xf32>
    %206 = arith.mulf %166, %189 : vector<8x128xf32>
    %207 = vector.shape_cast %206 : vector<8x128xf32> to vector<1x8x128xf32>
    %cst_62 = arith.constant dense<0.000000e+00> : vector<1xf32>
    %208 = vector.multi_reduction <add>, %207, %cst_62 [1, 2] : vector<1x8x128xf32> to vector<1xf32>
    %209 = vector.shape_cast %208 : vector<1xf32> to vector<1x1x1xf32>
    %210 = vector.extract %209[0, 0, 0] : f32 from vector<1x1x1xf32>
    %211 = vector.broadcast %210 : f32 to vector<1x1xf32>
    %cst_63 = arith.constant 1.250000e-02 : f32
    %212 = vector.broadcast %cst_63 : f32 to vector<1x1xf32>
    %213 = arith.mulf %211, %212 : vector<1x1xf32>
    %214 = arith.mulf %164, %189 : vector<8x128xf32>
    %215 = vector.shape_cast %214 : vector<8x128xf32> to vector<1x8x128xf32>
    %cst_64 = arith.constant dense<0.000000e+00> : vector<1xf32>
    %216 = vector.multi_reduction <add>, %215, %cst_64 [1, 2] : vector<1x8x128xf32> to vector<1xf32>
    %217 = vector.shape_cast %216 : vector<1xf32> to vector<1x1x1xf32>
    %218 = vector.extract %217[0, 0, 0] : f32 from vector<1x1x1xf32>
    %219 = vector.broadcast %218 : f32 to vector<1x1xf32>
    %cst_65 = arith.constant 0.00416666688 : f32
    %220 = vector.broadcast %cst_65 : f32 to vector<1x1xf32>
    %221 = arith.mulf %219, %220 : vector<1x1xf32>
    %222 = arith.mulf %177, %189 : vector<8x128xf32>
    %223 = vector.shape_cast %222 : vector<8x128xf32> to vector<1x8x128xf32>
    %cst_66 = arith.constant dense<0.000000e+00> : vector<1xf32>
    %224 = vector.multi_reduction <add>, %223, %cst_66 [1, 2] : vector<1x8x128xf32> to vector<1xf32>
    %225 = vector.shape_cast %224 : vector<1xf32> to vector<1x1x1xf32>
    %226 = vector.extract %225[0, 0, 0] : f32 from vector<1x1x1xf32>
    %227 = vector.broadcast %226 : f32 to vector<1x1xf32>
    %cst_67 = arith.constant 4.16666677E-4 : f32
    %228 = vector.broadcast %cst_67 : f32 to vector<1x1xf32>
    %229 = arith.mulf %227, %228 : vector<1x1xf32>
    %230 = tpu.iota {dimensions = array<i32: 1>} : vector<1x8xi32>
    %c0_i32_68 = arith.constant 0 : i32
    %231 = vector.broadcast %c0_i32_68 : i32 to vector<1x8xi32>
    %232 = arith.cmpi eq, %230, %231 : vector<1x8xi32>
    %cst_69 = arith.constant 0.000000e+00 : f32
    %233 = vector.shape_cast %197 : vector<1x1xf32> to vector<1x1xf32>
    %234 = vector.broadcast %233 : vector<1x1xf32> to vector<1x8xf32>
    %235 = vector.broadcast %cst_69 : f32 to vector<1x8xf32>
    %236 = arith.select %232, %234, %235 : vector<1x8xi1>, vector<1x8xf32>
    %c1_i32 = arith.constant 1 : i32
    %237 = vector.broadcast %c1_i32 : i32 to vector<1x8xi32>
    %238 = arith.cmpi eq, %230, %237 : vector<1x8xi32>
    %cst_70 = arith.constant 0.000000e+00 : f32
    %239 = vector.shape_cast %205 : vector<1x1xf32> to vector<1x1xf32>
    %240 = vector.broadcast %239 : vector<1x1xf32> to vector<1x8xf32>
    %241 = vector.broadcast %cst_70 : f32 to vector<1x8xf32>
    %242 = arith.select %238, %240, %241 : vector<1x8xi1>, vector<1x8xf32>
    %243 = arith.addf %236, %242 : vector<1x8xf32>
    %c2_i32 = arith.constant 2 : i32
    %244 = vector.broadcast %c2_i32 : i32 to vector<1x8xi32>
    %245 = arith.cmpi eq, %230, %244 : vector<1x8xi32>
    %cst_71 = arith.constant 0.000000e+00 : f32
    %246 = vector.shape_cast %213 : vector<1x1xf32> to vector<1x1xf32>
    %247 = vector.broadcast %246 : vector<1x1xf32> to vector<1x8xf32>
    %248 = vector.broadcast %cst_71 : f32 to vector<1x8xf32>
    %249 = arith.select %245, %247, %248 : vector<1x8xi1>, vector<1x8xf32>
    %250 = arith.addf %243, %249 : vector<1x8xf32>
    %c3_i32 = arith.constant 3 : i32
    %251 = vector.broadcast %c3_i32 : i32 to vector<1x8xi32>
    %252 = arith.cmpi eq, %230, %251 : vector<1x8xi32>
    %cst_72 = arith.constant 0.000000e+00 : f32
    %253 = vector.shape_cast %221 : vector<1x1xf32> to vector<1x1xf32>
    %254 = vector.broadcast %253 : vector<1x1xf32> to vector<1x8xf32>
    %255 = vector.broadcast %cst_72 : f32 to vector<1x8xf32>
    %256 = arith.select %252, %254, %255 : vector<1x8xi1>, vector<1x8xf32>
    %257 = arith.addf %250, %256 : vector<1x8xf32>
    %c4_i32 = arith.constant 4 : i32
    %258 = vector.broadcast %c4_i32 : i32 to vector<1x8xi32>
    %259 = arith.cmpi eq, %230, %258 : vector<1x8xi32>
    %cst_73 = arith.constant 0.000000e+00 : f32
    %260 = vector.shape_cast %229 : vector<1x1xf32> to vector<1x1xf32>
    %261 = vector.broadcast %260 : vector<1x1xf32> to vector<1x8xf32>
    %262 = vector.broadcast %cst_73 : f32 to vector<1x8xf32>
    %263 = arith.select %259, %261, %262 : vector<1x8xi1>, vector<1x8xf32>
    %264 = arith.addf %257, %263 : vector<1x8xf32>
    %c0_74 = arith.constant 0 : index
    %c0_75 = arith.constant 0 : index
    %265 = vector.load %arg2[%c0_74, %c0_75] : memref<1x8xf32, #tpu.memory_space<vmem>>, vector<1x8xf32>
    %266 = arith.addf %265, %264 : vector<1x8xf32>
    %c0_76 = arith.constant 0 : index
    %c0_77 = arith.constant 0 : index
    %267 = vector.load %arg2[%c0_76, %c0_77] : memref<1x8xf32, #tpu.memory_space<vmem>>, vector<1x8xf32>
    tpu.vector_store %arg2[%c0_76, %c0_77], %266 {strides = array<i32>} : memref<1x8xf32, #tpu.memory_space<vmem>>, vector<1x8xf32>,
    return
  }
  func.func @transform_0(%arg0: i32) -> (i32, i32, i32) {
    %c0_i32 = arith.constant 0 : i32
    %c0_i32_0 = arith.constant 0 : i32
    %c0_i32_1 = arith.constant 0 : i32
    return %c0_i32, %c0_i32_0, %arg0 : i32, i32, i32
  }
  func.func @transform_1(%arg0: i32) -> (i32, i32) {
    %c0_i32 = arith.constant 0 : i32
    %c0_i32_0 = arith.constant 0 : i32
    %c0_i32_1 = arith.constant 0 : i32
    return %c0_i32, %c0_i32_0 : i32, i32
  }
}

</mosaic_0001>

<bundles_post_ra>
// kernel: fwd.1
= control target key start
LH: loop header
LB: loop body
LE: loop exit
PB: predicated region body
PF: predicated region fallthrough
CT: control target
= control target key end

     0   :  { %v234_v0 = vlaneseq  ;;  %v373_v32 = vmov 0.0   ;;  %s612_s0 = inlined_call_operand.vmem [shape: f32[20,8,128], index: 0, kind: input, shape index: {}]   ;;  %s613_s1 = inlined_call_operand.vmem [shape: f32[1,8], index: 1, kind: output, shape index: {}]  }
   0x1   :  { %v342_v1 = vld [vmem:[%s612_s0 + $0x78] sm:$0xff]  ;;  %v343_v2 = vld [vmem:[%s612_s0 + $0x80] sm:$0xff]  ;;  %v340_v7 = vld [vmem:[%s612_s0 + $0x68] sm:$0xff] }
   0x2   :  { %v339_v3 = vld [vmem:[%s612_s0 + $0x60] sm:$0xff]  ;;  %v221_v4 = vsub.f32 %v343_v2, %v342_v1  ;;  %v235_v5 = vshrl.u32 %v234_v0, 7  ;;  %v393_v6 = vand.u32 127, %v234_v0  ;;  %v400_v9 = vmul.f32 %v343_v2, %v340_v7  ;;  %v336_v10 = vld [vmem:[%s612_s0 + $0x48] sm:$0xff]  ;;  %v337_v11 = vld [vmem:[%s612_s0 + $0x50] sm:$0xff] }
   0x3   :  { %v398_v8 = vmul.f32 %v343_v2, %v339_v3  ;;  %v341_v12 = vld [vmem:[%s612_s0 + $0x70] sm:$0xff]  ;;  %v66_v14 = vmul.f32 %v339_v3, %v339_v3  ;;  %v67_v15 = vmul.f32 %v340_v7, %v340_v7  ;;  %v338_v17 = vld [vmem:[%s612_s0 + $0x58] sm:$0xff]  ;;  %v61_v24 = vmul.f32 %v336_v10, %v336_v10  ;;  %v456_v56 = vld [vmem:[%s612_s0] sm:$0xff] }
   0x4   :  { %v241_v13 = vmul.u32 128, %v235_v5  ;;  %v89_v18 = vmul.f32 %v400_v9, %v400_v9  ;;  %v419_v19 = vadd.f32 -100.0, %v400_v9  ;;  %v422_v20 = vadd.f32 100.0, %v400_v9  ;;  %v462_v59 = vld [vmem:[%s612_s0 + $0x8] sm:$0xff]  ;;  %v467_v60 = vld [vmem:[%s612_s0 + $0x10] sm:$0xff]  ;;  %v473_v0 = vld [vmem:[%s612_s0 + $0x18] sm:$0xff] }
   0x5   :  { %v88_v16 = vmul.f32 %v398_v8, %v398_v8  ;;  %v55_v21 = vmul.f32 %v343_v2, %v341_v12  ;;  %v222_v22 = vand.u32 2147483647, %v221_v4  ;;  %v62_v25 = vmul.f32 %v337_v11, %v337_v11 }
   0x6   :  { %v242_v23 = vadd.s32 %v241_v13, %v393_v6  ;;  %v133_v26 = vmul.f32 %v419_v19, %v419_v19  ;;  %v176_v27 = vmul.f32 %v422_v20, %v422_v20  ;;  %v64_v28 = vmul.f32 %v338_v17, %v338_v17 }
   0x7   :  { %v63_v29 = vadd.f32 %v62_v25, %v61_v24  ;;  %v68_v30 = vadd.f32 %v67_v15, %v66_v14  ;;  %v69_v31 = vmul.f32 %v341_v12, %v341_v12  ;;  %v432_v34 = vadd.f32 115.470055, %v55_v21 }
   0x8   :  { %vm243_vm0 = vcmp.lt.s32.totalorder %v242_v23, 8  ;;  %v90_v35 = vadd.f32 %v89_v18, %v88_v16  ;;  %v435_v39 = vadd.f32 -57.735027, %v55_v21  ;;  %v134_v41 = vadd.f32 %v133_v26, %v88_v16  ;;  %v497_v23 = vld [vmem:[%s612_s0 + $0x28] sm:$0xff] }
   0x9   :  { %v430_v33 = vsel %vm243_vm0, 1.0, %v373_v32  ;;  %v65_v37 = vadd.f32 %v64_v28, %v63_v29  ;;  %v70_v38 = vadd.f32 %v69_v31, %v68_v30  ;;  %v91_v40 = vmul.f32 %v432_v34, %v432_v34 }
   0xa   :  { %v270_v36 = vmul.f32 %v430_v33, %v222_v22  ;;  %v177_v42 = vadd.f32 %v176_v27, %v88_v16  ;;  %v223_v43 = vmul.f32 %v342_v1, %v336_v10  ;;  %v135_v45 = vmul.f32 %v435_v39, %v435_v39 }
   0xb   :  { %v71_v44 = vmul.f32 %v70_v38, %v65_v37  ;;  %v226_v46 = vmul.f32 %v342_v1, %v337_v11  ;;  %v56_v47 = vmul.f32 %v339_v3, %v336_v10  ;;  %v57_v48 = vmul.f32 %v340_v7, %v337_v11 }
   0xc   :  { %271 = vadd.xlane.f32.xlu1 %v270_v36  ;;  %v441_v49 = vadd.f32 %v91_v40, %v90_v35  ;;  %v224_v50 = vsub.f32 %v223_v43, %v398_v8  ;;  %v446_v52 = vadd.f32 %v135_v45, %v134_v41  ;;  %v448_v53 = vadd.f32 %v177_v42, %v135_v45 }
   0xd   :  { %v444_v51 = vmax.f32 %v71_v44, 1e-16  ;;  %v227_v54 = vsub.f32 %v226_v46, %v400_v9  ;;  %v230_v55 = vmul.f32 %v342_v1, %v338_v17  ;;  %v58_v57 = vadd.f32 %v57_v48, %v56_v47  ;;  %v478_v1 = vld [vmem:[%s612_s0 + $0x20] sm:$0xff] }
   0xe   :  { %359 = vrsqrt.f32 %v441_v49  ;;  %v59_v58 = vmul.f32 %v341_v12, %v338_v17  ;;  %v225_v61 = vmul.f32 %v224_v50, %v224_v50  ;;  %v98_v2 = vmul.f32 %v456_v56, %v456_v56  ;;  %v515_v50 = vld [vmem:[%s612_s0 + $0x30] sm:$0xff] }
   0xf   :  { %361 = vrsqrt.f32 %v444_v51  ;;  %v228_v62 = vmul.f32 %v227_v54, %v227_v54  ;;  %v231_v63 = vsub.f32 %v230_v55, %v55_v21  ;;  %v99_v4 = vmul.f32 %v462_v59, %v462_v59  ;;  %v520_v54 = vld [vmem:[%s612_s0 + $0x38] sm:$0xff] }
  0x10   :  { %363 = vrsqrt.f32 %v446_v52  ;;  %v101_v5 = vmul.f32 %v467_v60, %v467_v60  ;;  %v60_v10 = vadd.f32 %v59_v58, %v58_v57  ;;  %v142_v15 = vmul.f32 %v473_v0, %v473_v0 }
  0x11   :  { %365 = vrsqrt.f32 %v448_v53  ;;  %v229_v3 = vadd.f32 %v228_v62, %v225_v61  ;;  %v232_v11 = vmul.f32 %v231_v63, %v231_v63  ;;  %v100_v14 = vadd.f32 %v99_v4, %v98_v2  ;;  %v532_v61 = vld [vmem:[%s612_s0 + $0x40] sm:$0xff] }
  0x12   :  { %v143_v16 = vmul.f32 %v478_v1, %v478_v1  ;;  %vm124_vm1 = vcmp.eq.f32.partialorder %v441_v49, inf  ;;  %v127_v21 = vand.u32 2147483648, %v441_v49  ;;  %vm126_vm2 = vcmp.eq.f32.partialorder %v441_v49, 0.0 }
  0x13   :  { %v233_v22 = vadd.f32 %v232_v11, %v229_v3  ;;  %v102_v27 = vadd.f32 %v101_v5, %v100_v14  ;;  %vm79_vm3 = vweird.f32 %v444_v51  ;;  %v145_v38 = vmul.f32 %v497_v23, %v497_v23 }
  0x14   :  { %v360_v7 = vpop.eup %359  ;;  %v144_v28 = vadd.f32 %v143_v16, %v142_v15  ;;  %vm168_vm5 = vcmp.eq.f32.partialorder %v446_v52, inf  ;;  %vm170_vm6 = vcmp.eq.f32.partialorder %v446_v52, 0.0  ;;  %v171_v47 = vand.u32 2147483648, %v446_v52 }
  0x15   :  { %v362_v12 = vpop.eup %361  ;;  %v118_v13 = vmul.f32 %v360_v7, %v441_v49  ;;  %v294_v31 = vmul.f32 %v430_v33, %v233_v22  ;;  %v103_v37 = vmul.f32 %v102_v27, %v441_v49  ;;  %vm210_vm8 = vcmp.eq.f32.partialorder %v448_v53, inf }
  0x16   :  { %v364_v17 = vpop.eup %363  ;;  %v74_v18 = vmul.f32 %v362_v12, %v444_v51  ;;  %vm80_vm4 = vweird.f32 %v362_v12  ;;  %v146_v45 = vadd.f32 %v145_v38, %v144_v28  ;;  %v213_v2 = vand.u32 2147483648, %v448_v53  ;;  %v346_v28 = vld [vmem:[%s612_s0 + $0x98] sm:$0xff] }
  0x17   :  { %v366_v24 = vpop.eup %365  ;;  %v119_v25 = vmul.f32 %v360_v7, %v118_v13  ;;  %v162_v26 = vmul.f32 %v364_v17, %v446_v52  ;;  %295 = vadd.xlane.f32.xlu2 %v294_v31  ;;  %v508_v44 = vmax.f32 %v103_v37, 1e-16  ;;  %vm524_vm7 = vmor %vm79_vm3, %vm80_vm4  ;;  %v184_v5 = vmul.f32 %v515_v50, %v515_v50  ;;  %v344_v13 = vld [vmem:[%s612_s0 + $0x88] sm:$0xff] }
  0x18   :  { %v75_v29 = vmul.f32 %v362_v12, %v74_v18  ;;  %v204_v30 = vmul.f32 %v366_v24, %v448_v53  ;;  %v147_v51 = vmul.f32 %v146_v45, %v446_v52  ;;  %v187_v16 = vmul.f32 %v532_v61, %v532_v61 }
  0x19   :  { %v120_v35 = vmul.f32 0.5, %v119_v25  ;;  %v163_v36 = vmul.f32 %v364_v17, %v162_v26  ;;  %367 = vrsqrt.f32 %v508_v44  ;;  %vm212_vm9 = vcmp.eq.f32.partialorder %v448_v53, 0.0 }
  0x1a   :  { %v76_v40 = vmul.f32 0.5, %v75_v29  ;;  %v205_v41 = vmul.f32 %v366_v24, %v204_v30  ;;  %v148_v15 = vmax.f32 %v147_v51, 1e-16  ;;  %vm111_vm10 = vweird.f32 %v508_v44 }
  0x1b   :  { %v121_v42 = vsub.f32 1.5, %v120_v35  ;;  %v164_v43 = vmul.f32 0.5, %v163_v36  ;;  %v93_v35 = vmul.f32 %v398_v8, %v456_v56  ;;  %vm12_vm3 = vcmask 57344  }
  0x1c   :  { %v77_v46 = vsub.f32 1.5, %v76_v40  ;;  %v206_v48 = vmul.f32 0.5, %v205_v41  ;;  %369 = vrsqrt.f32 %v148_v15  ;;  %vm155_vm12 = vweird.f32 %v148_v15  ;;  %13 = vst.msk [vmem:[%s613_s1] sm:$0x1] %vm12_vm3, %v373_v32 }
  0x1d   :  { %v122_v57 = vmul.f32 %v360_v7, %v121_v42  ;;  %v165_v58 = vsub.f32 1.5, %v164_v43  ;;  %v185_v7 = vmul.f32 %v520_v54, %v520_v54  ;;  %v94_v43 = vmul.f32 %v462_v59, %v400_v9 }
  0x1e   :  { %v78_v62 = vmul.f32 %v362_v12, %v77_v46  ;;  %v207_v63 = vsub.f32 1.5, %v206_v48  ;;  %v96_v59 = vmul.f32 %v467_v60, %v432_v34  ;;  %v179_v34 = vmul.f32 %v515_v50, %v398_v8 }
  0x1f   :  { %v123_v3 = vmul.f32 %v122_v57, %v441_v49  ;;  %v166_v4 = vmul.f32 %v364_v17, %v165_v58  ;;  %v186_v25 = vadd.f32 %v185_v7, %v184_v5  ;;  %v138_v57 = vmul.f32 %v478_v1, %v419_v19 }
  0x20   :  { %v82_v11 = vsel %vm524_vm7, %v362_v12, %v78_v62  ;;  %v208_v14 = vmul.f32 %v366_v24, %v207_v63  ;;  %v345_v12 = vld [vmem:[%s612_s0 + $0x90] sm:$0xff]  ;;  %v180_v60 = vmul.f32 %v520_v54, %v422_v20  ;;  %vm306_vm4 = vcmp.eq.s32.totalorder %v393_v6, 0 }
  0x21   :  { %v83_v18 = vmul.f32 %v82_v11, %v60_v10  ;;  %v125_v17 = vsel %vm124_vm1, %v441_v49, %v123_v3  ;;  %v167_v22 = vmul.f32 %v166_v4, %v446_v52  ;;  %v368_v10 = vpop.eup %367  ;;  %v188_v31 = vadd.f32 %v187_v16, %v186_v25 }
  0x22   :  { %v128_v26 = vsel %vm126_vm2, %v127_v21, %v125_v17  ;;  %v209_v24 = vmul.f32 %v208_v14, %v448_v53  ;;  %v106_v36 = vmul.f32 %v368_v10, %v508_v44  ;;  %v370_v56 = vpop.eup %369  ;;  %vm112_vm11 = vweird.f32 %v368_v10 }
  0x23   :  { %v84_v27 = vsub.f32 1.0, %v83_v18  ;;  %v129_v29 = vsub.f32 %v128_v26, %v344_v13  ;;  %v169_v30 = vsel %vm168_vm5, %v446_v52, %v167_v22  ;;  %v189_v45 = vmul.f32 %v188_v31, %v448_v53  ;;  %vm113_vm14 = vmor %vm111_vm10, %vm112_vm11 }
  0x24   :  { %v172_v49 = vsel %vm170_vm6, %v171_v47, %v169_v30  ;;  %v211_v21 = vsel %vm210_vm8, %v448_v53, %v209_v24  ;;  %v107_v52 = vmul.f32 %v368_v10, %v106_v36  ;;  %v137_v47 = vmul.f32 %v473_v0, %v398_v8 }
  0x25   :  { %v246_v37 = vmul.f32 %v430_v33, %v84_v27  ;;  %v130_v38 = vand.u32 2147483647, %v129_v29  ;;  %v173_v40 = vsub.f32 %v172_v49, %v345_v12  ;;  %v214_v41 = vsel %vm212_vm9, %v213_v2, %v211_v21 }
  0x26   :  { %v215_v42 = vsub.f32 %v214_v41, %v346_v28  ;;  %v108_v55 = vmul.f32 0.5, %v107_v52  ;;  %v190_v58 = vmax.f32 %v189_v45, 1e-16  ;;  %v150_v63 = vmul.f32 %v370_v56, %v148_v15 }
  0x27   :  { %247 = vadd.xlane.f32.xlu0 %v246_v37  ;;  %v174_v46 = vand.u32 2147483647, %v173_v40  ;;  %v95_v2 = vadd.f32 %v94_v43, %v93_v35  ;;  %v139_v0 = vadd.f32 %v138_v57, %v137_v47  ;;  %v140_v3 = vmul.f32 %v497_v23, %v435_v39 }
  0x28   :  { %v216_v48 = vand.u32 2147483647, %v215_v42  ;;  %v109_v51 = vsub.f32 1.5, %v108_v55  ;;  %371 = vrsqrt.f32 %v190_v58  ;;  %v151_v53 = vmul.f32 %v370_v56, %v150_v63 }
  0x29   :  { %v219_v62 = vadd.f32 %v174_v46, %v130_v38  ;;  %vm156_vm13 = vweird.f32 %v370_v56  ;;  %v97_v44 = vadd.f32 %v96_v59, %v95_v2  ;;  %v141_v11 = vadd.f32 %v140_v3, %v139_v0 }
  0x2a   :  { %v110_v1 = vmul.f32 %v368_v10, %v109_v51  ;;  %v152_v4 = vmul.f32 0.5, %v151_v53  ;;  %vm157_vm15 = vmor %vm155_vm12, %vm156_vm13  ;;  %v181_v22 = vadd.f32 %v180_v60, %v179_v34  ;;  %v182_v25 = vmul.f32 %v532_v61, %v435_v39 }
  0x2b   :  { %v220_v9 = vadd.f32 %v219_v62, %v216_v48  ;;  %vm197_vm0 = vweird.f32 %v190_v58  ;;  %vm308_vm5 = vcmp.eq.s32.totalorder %v393_v6, 1  ;;  %vm311_vm6 = vcmp.eq.s32.totalorder %v393_v6, 2 }
  0x2c   :  { %v153_v5 = vsub.f32 1.5, %v152_v4  ;;  %v114_v23 = vsel %vm113_vm14, %v368_v10, %v110_v1  ;;  %v183_v50 = vadd.f32 %v182_v25, %v181_v22  ;;  %vm314_vm7 = vcmp.eq.s32.totalorder %v393_v6, 3 }
  0x2d   :  { %v282_v19 = vmul.f32 %v430_v33, %v220_v9  ;;  %v115_v18 = vmul.f32 %v114_v23, %v97_v44  ;;  %vm317_vm8 = vcmp.eq.s32.totalorder %v393_v6, 4 }
  0x2e   :  { %v372_v7 = vpop.eup %371  ;;  %v154_v13 = vmul.f32 %v370_v56, %v153_v5 }
  0x2f   :  { %283 = vadd.xlane.f32.xlu1 %v282_v19  ;;  %v192_v14 = vmul.f32 %v372_v7, %v190_v58  ;;  %vm198_vm1 = vweird.f32 %v372_v7  ;;  %v116_v24 = vsub.f32 1.0, %v115_v18 }
  0x30   :  { %v158_v15 = vsel %vm157_vm15, %v370_v56, %v154_v13  ;;  %vm199_vm2 = vmor %vm197_vm0, %vm198_vm1 }
  0x31   :  { %v193_v16 = vmul.f32 %v372_v7, %v192_v14  ;;  %v159_v17 = vmul.f32 %v158_v15, %v141_v11 }
  0x33   :  { %v194_v12 = vmul.f32 0.5, %v193_v16  ;;  %v160_v8 = vsub.f32 1.0, %v159_v17 }
  0x35   :  { %v195_v26 = vsub.f32 1.5, %v194_v12  ;;  %v217_v27 = vadd.f32 %v160_v8, %v116_v24  ;;  %v320_v24 = vld [vmem:[%s613_s1] sm:$0x1] }
  0x37   :  { %v196_v20 = vmul.f32 %v372_v7, %v195_v26 }
  0x39   :  { %v200_v54 = vsel %vm199_vm2, %v372_v7, %v196_v20 }
  0x3a   :  { %v201_v10 = vmul.f32 %v200_v54, %v183_v50 }
  0x3c   :  { %v202_v28 = vsub.f32 1.0, %v201_v10 }
  0x3e   :  { %v218_v29 = vadd.f32 %v217_v27, %v202_v28 }
  0x40   :  { %v258_v30 = vmul.f32 %v430_v33, %v218_v29 }
  0x42   :  { %259 = vadd.xlane.f32.xlu0 %v258_v30 }
  0x7f   :  { %v272_v21 = vpop.xlane.xlu1 %271 }
  0x80   :  { %v273_v42 = vrot.slane %v272_v21, 4 }
  0x82   :  { %v274_v45 = vadd.f32 %v273_v42, %v272_v21 }
  0x84   :  { %v275_v33 = vrot.slane %v274_v45, 2 }
  0x86   :  { %v276_v63 = vadd.f32 %v275_v33, %v274_v45 }
  0x88   :  { %v277_v53 = vrot.slane %v276_v63, 1 }
  0x8a   :  { %v296_v40 = vpop.xlane.xlu2 %295  ;;  %v278_v1 = vadd.f32 %v277_v53, %v276_v63 }
  0x8b   :  { %v297_v43 = vrot.slane %v296_v40, 4 }
  0x8d   :  { %v298_v46 = vadd.f32 %v297_v43, %v296_v40 }
  0x8f   :  { %v299_v56 = vrot.slane %v298_v46, 2 }
  0x91   :  { %v300_v62 = vadd.f32 %v299_v56, %v298_v46 }
  0x93   :  { %v301_v59 = vrot.slane %v300_v62, 1 }
  0x95   :  { %v302_v4 = vadd.f32 %v301_v59, %v300_v62 }
  0x9a   :  { %v248_v31 = vpop.xlane.xlu0 %247 }
  0x9b   :  { %v249_v49 = vrot.slane %v248_v31, 4 }
  0x9d   :  { %v250_v39 = vadd.f32 %v249_v49, %v248_v31 }
  0x9f   :  { %v251_v61 = vrot.slane %v250_v39, 2 }
  0xa1   :  { %v252_v35 = vadd.f32 %v251_v61, %v250_v39 }
  0xa2   :  { %v284_v38 = vpop.xlane.xlu1 %283 }
  0xa3   :  { %v253_v36 = vrot.slane %v252_v35, 1  ;;  %v285_v41 = vrot.slane %v284_v38, 4 }
  0xa5   :  { %v254_v37 = vadd.f32 %v253_v36, %v252_v35  ;;  %v286_v52 = vadd.f32 %v285_v41, %v284_v38 }
  0xa7   :  { %348 = vpush %v254_v37  ;;  %v287_v47 = vrot.slane %v286_v52, 2 }
  0xa9   :  { %v288_v57 = vadd.f32 %v287_v47, %v286_v52 }
  0xab   :  { %v289_v9 = vrot.slane %v288_v57, 1 }
  0xad   :  { %v290_v19 = vadd.f32 %v289_v9, %v288_v57 }
  0xb5   :  { %v260_v48 = vpop.xlane.xlu0 %259 }
  0xb6   :  { %v261_v55 = vrot.slane %v260_v48, 4 }
  0xb8   :  { %v262_v58 = vadd.f32 %v261_v55, %v260_v48 }
  0xba   :  { %v263_v2 = vrot.slane %v262_v58, 2 }
  0xbc   :  { %v264_v51 = vadd.f32 %v263_v2, %v262_v58 }
  0xbe   :  { %v265_v0 = vrot.slane %v264_v51, 1 }
  0xc0   :  { %v266_v3 = vadd.f32 %v265_v0, %v264_v51 }
  0xc2   :  { %350 = vpush %v266_v3 }
  0xc3   :  { %352 = vpush %v278_v1 }
  0xc4   :  { %354 = vpush %v290_v19 }
  0xc5   :  { %356 = vpush %v302_v4 }
  0xd8   :  { %s349_s18 = spop %348 }
  0xd9   :  { %v256_v5 = vstv %s349_s18 }
  0xda   :  { %v257_v7 = vmul.f32 0.125, %v256_v5 }
  0xdc   :  { %v307_v13 = vsel %vm306_vm4, %v257_v7, 0.0 }
  0xf3   :  { %s351_s19 = spop %350 }
  0xf4   :  { %v268_v44 = vstv %s351_s19  ;;  %s353_s20 = spop %352 }
  0xf5   :  { %v269_v11 = vmul.f32 0.041666668, %v268_v44  ;;  %v280_v34 = vstv %s353_s20  ;;  %s355_s21 = spop %354 }
  0xf6   :  { %v281_v60 = vmul.f32 0.0125, %v280_v34  ;;  %v292_v23 = vstv %s355_s21  ;;  %s357_s22 = spop %356 }
  0xf7   :  { %v309_v32 = vsel %vm308_vm5, %v269_v11, 0.0  ;;  %v293_v14 = vmul.f32 0.004166667, %v292_v23  ;;  %v304_v15 = vstv %s357_s22 }
  0xf8   :  { %v310_v16 = vadd.f32 %v309_v32, %v307_v13  ;;  %v312_v18 = vsel %vm311_vm6, %v281_v60, 0.0  ;;  %v305_v17 = vmul.f32 0.00041666668, %v304_v15 }
  0xf9   :  { %v315_v25 = vsel %vm314_vm7, %v293_v14, 0.0 }
  0xfa   :  { %v313_v22 = vadd.f32 %v312_v18, %v310_v16  ;;  %v318_v26 = vsel %vm317_vm8, %v305_v17, 0.0 }
  0xfc   :  { %v316_v12 = vadd.f32 %v315_v25, %v313_v22 }
  0xfe   :  { %v319_v8 = vadd.f32 %v318_v26, %v316_v12 }
 0x100   :  { %v321_v50 = vadd.f32 %v320_v24, %v319_v8 }
 0x102   :  { %323 = vst.msk [vmem:[%s613_s1] sm:$0x1] %vm12_vm3, %v321_v50 }

</bundles_post_ra>
